<compile_context>
chip_gen: v7x
topology: tpu7x:2x2x1
jax: 0.10.0
libtpu: 0.0.40
codegen_flags: <defaults>
</compile_context>

<pallas_src>
import jax
import jax.numpy as jnp
from jax.experimental import pallas as pl
from jax.experimental.pallas import tpu as pltpu

N, C_IN, H, W = 1, 10, 3, 11
C_OUT, KH, KW = 10, 3, 3
H_OUT, W_OUT = H - KH + 1, W - KW + 1        # 1, 9
REPS = 3                                      # torch.cat([x, x, x], dim=1)
CK = C_IN * KH                                # 30  (im2col rows per kw tap)


def _fused_kernel(params_ref, x_ref, out_ref):
    # params_ref: (KW+1, C_OUT, CK) = (4, 10, 30)
    #             slabs 0..2 = -3 * W[kw]   (C_OUT, C_IN*KH)
    #             slab  3, lane 0 column = -3 * bias
    # x_ref:      (CK, W)  = (30, 11)    image; im2col done via lane shifts
    # out_ref:    (REPS*C_OUT, W_OUT) = (30, 9)
    #
    # Conv as a sum of KW shifted matmuls (static lane slices, MXU f32 acc).
    acc = jnp.dot(params_ref[0], x_ref[:, 0:W_OUT],
                  preferred_element_type=jnp.float32)
    acc = acc + jnp.dot(params_ref[1], x_ref[:, 1:1 + W_OUT],
                        preferred_element_type=jnp.float32)
    acc = acc + jnp.dot(params_ref[2], x_ref[:, 2:2 + W_OUT],
                        preferred_element_type=jnp.float32)
    b = params_ref[3, :, 0:1]                  # (10, 1)  -3-scaled bias column
    y = acc + b                                # (-3 * conv(x)), (10, 9)

    # TODO(synk): torch.dropout(x) in the reference is malformed (missing
    # p/train); treated as identity (eval-mode / p=0).

    # Activate ONCE on the (10, 9) tile, then replicate 3x via plain stores.
    z = jnp.maximum(y, 0.0)                    # relu(-3 * conv(x))
    s = jax.nn.sigmoid(1.0 - z)                # C == 30 != 1 branch
    a = jnp.sin(s)                             # (10, 9)

    out_ref[0:C_OUT, :] = a
    out_ref[C_OUT:2 * C_OUT, :] = a
    out_ref[2 * C_OUT:3 * C_OUT, :] = a


def prepare_params(weight, bias):
    """One-time parameter transform.

    weight: (C_OUT, C_IN, KH, KW), bias: (C_OUT,)
    Returns a single packed params array of shape (KW+1, C_OUT, C_IN*KH):
    slabs 0..KW-1 are the per-kw-tap weights, slab KW holds the bias in lane
    column 0.  Everything is pre-scaled by -3 (fold of `-3.0 * x`).
    """
    w_kw = jnp.transpose(weight, (3, 0, 1, 2)).reshape(KW, C_OUT, CK)
    b_slab = jnp.zeros((1, C_OUT, CK), jnp.float32).at[0, :, 0].set(bias)
    params = jnp.concatenate([w_kw.astype(jnp.float32), b_slab], axis=0)
    return (-3.0 * params).astype(jnp.float32)           # (4, 10, 30)


@jax.jit
def fused_forward(x, params):
    """x: (n, C_IN, H, W) NCHW f32; params from prepare_params."""
    n = x.shape[0]
    # NCHW (n, 10, 3, 11) -> (n, C_IN*KH, W) = (n, 30, 11): pure reshape.
    x3 = x.reshape(n, CK, W)

    out = pl.pallas_call(
        _fused_kernel,
        out_shape=jax.ShapeDtypeStruct((n, REPS * C_OUT, W_OUT), jnp.float32),
        grid=(n,),
        in_specs=[
            # Constant operand: same block for every grid step -> stays
            # resident in VMEM, no per-step re-fetch.
            pl.BlockSpec((KW + 1, C_OUT, CK), lambda b: (0, 0, 0)),
            pl.BlockSpec((pl.Squeezed(), CK, W), lambda b: (b, 0, 0)),
        ],
        out_specs=pl.BlockSpec((pl.Squeezed(), REPS * C_OUT, W_OUT),
                               lambda b: (b, 0, 0)),
        compiler_params=pltpu.CompilerParams(
            dimension_semantics=("parallel",)),
    )(params, x3)                               # (n, 30, 9)

    # (n, 30, 9) -> (n, 30, 1, 9): pure reshape (row-major matches the cat).
    return out.reshape(n, REPS * C_OUT, H_OUT, W_OUT)


if __name__ == "__main__":
    key = jax.random.PRNGKey(0)
    kx, kw, kb = jax.random.split(key, 3)

    # Conv2d(10, 10, 3)-shaped parameters.
    fan_in = C_IN * KH * KW
    bound = 1.0 / (fan_in ** 0.5)
    weight = jax.random.uniform(kw, (C_OUT, C_IN, KH, KW),
                                minval=-bound, maxval=bound, dtype=jnp.float32)
    bias = jax.random.uniform(kb, (C_OUT,),
                              minval=-bound, maxval=bound, dtype=jnp.float32)

    x = jax.random.normal(kx, (N, C_IN, H, W), dtype=jnp.float32)

    params = prepare_params(weight, bias)
    y = fused_forward(x, params)
    jax.block_until_ready(y)
    assert y.shape == (1, 30, 1, 9), y.shape

    # Pure-JAX reference (high precision) for a sanity check.
    conv = jax.lax.conv_general_dilated(
        x, weight, window_strides=(1, 1), padding="VALID",
        dimension_numbers=("NCHW", "OIHW", "NCHW"),
        precision=jax.lax.Precision.HIGHEST) + bias.reshape(1, C_OUT, 1, 1)
    ref = jnp.concatenate([conv, conv, conv], axis=1)
    ref = jnp.maximum(-3.0 * ref, 0.0)
    ref = jax.nn.sigmoid(1.0 - ref)
    ref = jnp.sin(ref)
    assert jnp.allclose(y, ref, atol=5e-4, rtol=5e-4), \
        float(jnp.max(jnp.abs(y - ref)))

    print("KERNEL_OK")
</pallas_src>

<mosaic_0001>
module attributes {stable_mosaic.version = 11 : i64} {
  func.func @_fused_kernel(%arg0: i32, %arg1: memref<4x10x30xf32, #tpu.memory_space<vmem>>, %arg2: memref<1x30x11xf32, #tpu.memory_space<vmem>>, %arg3: memref<1x30x9xf32, #tpu.memory_space<vmem>>) attributes {dimension_semantics = [#tpu.dimension_semantics<parallel>], iteration_bounds = array<i64: 1>, scalar_prefetch = 0 : i64, scratch_operands = 0 : i64, tpu.core_type = #tpu.core_type<tc>, window_params = [{pipeline_mode = #tpu.pipeline_mode<synchronous>, transform_indices = @transform_0, window_bounds = array<i64: 4, 10, 30>}, {transform_indices = @transform_1, window_bounds = array<i64: 1, 30, 11>}, {transform_indices = @transform_2, window_bounds = array<i64: 1, 30, 9>}]} {
    %c0 = arith.constant 0 : index
    %c0_0 = arith.constant 0 : index
    %c0_1 = arith.constant 0 : index
    %0 = vector.load %arg1[%c0, %c0_0, %c0_1] : memref<4x10x30xf32, #tpu.memory_space<vmem>>, vector<1x10x30xf32>
    %1 = vector.shape_cast %0 : vector<1x10x30xf32> to vector<10x30xf32>
    %c0_2 = arith.constant 0 : index
    %c0_3 = arith.constant 0 : index
    %c0_4 = arith.constant 0 : index
    %2 = vector.load %arg2[%c0_2, %c0_3, %c0_4] : memref<1x30x11xf32, #tpu.memory_space<vmem>>, vector<1x30x9xf32>
    %3 = vector.shape_cast %2 : vector<1x30x9xf32> to vector<30x9xf32>
    %cst = arith.constant dense<0.000000e+00> : vector<10x9xf32>
    %4 = tpu.matmul %1, %3, %cst {dimension_numbers = #tpu.dot_dimension_numbers<[1], [0], [0], [1], [0, 0, 1, 1], [], []>} : vector<10x30xf32>, vector<30x9xf32>, vector<10x9xf32> -> vector<10x9xf32>
    %c1 = arith.constant 1 : index
    %c0_5 = arith.constant 0 : index
    %c0_6 = arith.constant 0 : index
    %5 = vector.load %arg1[%c1, %c0_5, %c0_6] : memref<4x10x30xf32, #tpu.memory_space<vmem>>, vector<1x10x30xf32>
    %6 = vector.shape_cast %5 : vector<1x10x30xf32> to vector<10x30xf32>
    %c0_7 = arith.constant 0 : index
    %c0_8 = arith.constant 0 : index
    %c1_9 = arith.constant 1 : index
    %7 = vector.load %arg2[%c0_7, %c0_8, %c1_9] : memref<1x30x11xf32, #tpu.memory_space<vmem>>, vector<1x30x9xf32>
    %8 = vector.shape_cast %7 : vector<1x30x9xf32> to vector<30x9xf32>
    %cst_10 = arith.constant dense<0.000000e+00> : vector<10x9xf32>
    %9 = tpu.matmul %6, %8, %cst_10 {dimension_numbers = #tpu.dot_dimension_numbers<[1], [0], [0], [1], [0, 0, 1, 1], [], []>} : vector<10x30xf32>, vector<30x9xf32>, vector<10x9xf32> -> vector<10x9xf32>
    %10 = arith.addf %4, %9 : vector<10x9xf32>
    %c2 = arith.constant 2 : index
    %c0_11 = arith.constant 0 : index
    %c0_12 = arith.constant 0 : index
    %11 = vector.load %arg1[%c2, %c0_11, %c0_12] : memref<4x10x30xf32, #tpu.memory_space<vmem>>, vector<1x10x30xf32>
    %12 = vector.shape_cast %11 : vector<1x10x30xf32> to vector<10x30xf32>
    %c0_13 = arith.constant 0 : index
    %c0_14 = arith.constant 0 : index
    %c2_15 = arith.constant 2 : index
    %13 = vector.load %arg2[%c0_13, %c0_14, %c2_15] : memref<1x30x11xf32, #tpu.memory_space<vmem>>, vector<1x30x9xf32>
    %14 = vector.shape_cast %13 : vector<1x30x9xf32> to vector<30x9xf32>
    %cst_16 = arith.constant dense<0.000000e+00> : vector<10x9xf32>
    %15 = tpu.matmul %12, %14, %cst_16 {dimension_numbers = #tpu.dot_dimension_numbers<[1], [0], [0], [1], [0, 0, 1, 1], [], []>} : vector<10x30xf32>, vector<30x9xf32>, vector<10x9xf32> -> vector<10x9xf32>
    %16 = arith.addf %10, %15 : vector<10x9xf32>
    %c3 = arith.constant 3 : index
    %c0_17 = arith.constant 0 : index
    %c0_18 = arith.constant 0 : index
    %17 = vector.load %arg1[%c3, %c0_17, %c0_18] : memref<4x10x30xf32, #tpu.memory_space<vmem>>, vector<1x10x1xf32>
    %18 = vector.shape_cast %17 : vector<1x10x1xf32> to vector<10x1xf32>
    %19 = vector.broadcast %18 : vector<10x1xf32> to vector<10x9xf32>
    %20 = arith.addf %16, %19 : vector<10x9xf32>
    %cst_19 = arith.constant 0.000000e+00 : f32
    %21 = vector.broadcast %cst_19 : f32 to vector<10x9xf32>
    %22 = arith.maximumf %20, %21 : vector<10x9xf32>
    %cst_20 = arith.constant 1.000000e+00 : f32
    %23 = vector.broadcast %cst_20 : f32 to vector<10x9xf32>
    %24 = arith.subf %23, %22 : vector<10x9xf32>
    %25 = arith.negf %24 : vector<10x9xf32>
    %26 = math.exp %25 : vector<10x9xf32>
    %cst_21 = arith.constant 1.000000e+00 : f32
    %27 = vector.broadcast %cst_21 : f32 to vector<10x9xf32>
    %28 = arith.addf %27, %26 : vector<10x9xf32>
    %29 = arith.divf %27, %28 : vector<10x9xf32>
    %30 = math.sin %29 : vector<10x9xf32>
    %c0_22 = arith.constant 0 : index
    %c0_23 = arith.constant 0 : index
    %c0_24 = arith.constant 0 : index
    %31 = vector.load %arg3[%c0_22, %c0_23, %c0_24] : memref<1x30x9xf32, #tpu.memory_space<vmem>>, vector<1x10x9xf32>
    %32 = vector.shape_cast %31 : vector<1x10x9xf32> to vector<10x9xf32>
    %33 = vector.shape_cast %30 : vector<10x9xf32> to vector<1x10x9xf32>
    tpu.vector_store %arg3[%c0_22, %c0_23, %c0_24], %33 {strides = array<i32>} : memref<1x30x9xf32, #tpu.memory_space<vmem>>, vector<1x10x9xf32>,
    %c0_25 = arith.constant 0 : index
    %c10 = arith.constant 10 : index
    %c0_26 = arith.constant 0 : index
    %34 = vector.load %arg3[%c0_25, %c10, %c0_26] : memref<1x30x9xf32, #tpu.memory_space<vmem>>, vector<1x10x9xf32>
    %35 = vector.shape_cast %34 : vector<1x10x9xf32> to vector<10x9xf32>
    %36 = vector.shape_cast %30 : vector<10x9xf32> to vector<1x10x9xf32>
    tpu.vector_store %arg3[%c0_25, %c10, %c0_26], %36 {strides = array<i32>} : memref<1x30x9xf32, #tpu.memory_space<vmem>>, vector<1x10x9xf32>,
    %c0_27 = arith.constant 0 : index
    %c20 = arith.constant 20 : index
    %c0_28 = arith.constant 0 : index
    %37 = vector.load %arg3[%c0_27, %c20, %c0_28] : memref<1x30x9xf32, #tpu.memory_space<vmem>>, vector<1x10x9xf32>
    %38 = vector.shape_cast %37 : vector<1x10x9xf32> to vector<10x9xf32>
    %39 = vector.shape_cast %30 : vector<10x9xf32> to vector<1x10x9xf32>
    tpu.vector_store %arg3[%c0_27, %c20, %c0_28], %39 {strides = array<i32>} : memref<1x30x9xf32, #tpu.memory_space<vmem>>, vector<1x10x9xf32>,
    return
  }
  func.func @transform_0(%arg0: i32) -> (i32, i32, i32) {
    %c0_i32 = arith.constant 0 : i32
    %c0_i32_0 = arith.constant 0 : i32
    %c0_i32_1 = arith.constant 0 : i32
    %c0_i32_2 = arith.constant 0 : i32
    return %c0_i32, %c0_i32_0, %c0_i32_1 : i32, i32, i32
  }
  func.func @transform_1(%arg0: i32) -> (i32, i32, i32) {
    %c0_i32 = arith.constant 0 : i32
    %c0_i32_0 = arith.constant 0 : i32
    %c0_i32_1 = arith.constant 0 : i32
    return %arg0, %c0_i32, %c0_i32_0 : i32, i32, i32
  }
  func.func @transform_2(%arg0: i32) -> (i32, i32, i32) {
    %c0_i32 = arith.constant 0 : i32
    %c0_i32_0 = arith.constant 0 : i32
    %c0_i32_1 = arith.constant 0 : i32
    return %arg0, %c0_i32, %c0_i32_0 : i32, i32, i32
  }
}

</mosaic_0001>

<bundles_post_ra>
// kernel: fused_forward.1
= control target key start
LH: loop header
LB: loop body
LE: loop exit
PB: predicated region body
PF: predicated region fallthrough
CT: control target
= control target key end

     0   :  { %vm42_vm0 = vcmask 1045504   ;;  %vm35_vm1 = vcmask 244736   ;;  %vm719_vm2 = vmmov 1   ;;  %s720_s19 = smov 127   ;;  %v722_v11 = vmov 0   ;;  %s897_s1 = inlined_call_operand.vmem [shape: f32[1,30,11], index: 1, kind: input, shape index: {}]   ;;  %s898_s0 = inlined_call_operand.vmem [shape: f32[4,10,30], index: 0, kind: input, shape index: {}]   ;;  %s899_s2 = inlined_call_operand.vmem [shape: f32[1,30,9], index: 2, kind: output, shape index: {}]  }
   0x1   :  { %v13_v0 = vld [vmem:[%s897_s1] sm:$0xff]  ;;  %v14_v1 = vld [vmem:[%s897_s1 + $0x8] sm:$0xff]  ;;  %v15_v2 = vld [vmem:[%s897_s1 + $0x10] sm:$0xff]  ;;  %702 = vset.pattern.permute.xlu1 %v722_v11  ;;  %701 = vset.pattern.permute.xlu0 %v722_v11 }
   0x2   :  { %v681_v3 = vpack.i.bf16 %v14_v1, %v13_v0  ;;  %v16_v4 = vld [vmem:[%s897_s1 + $0x18] sm:$0x3f]  ;;  %v639_v5 = vpack.c.bf16 %v14_v1, %v13_v0  ;;  %v11_v6 = vld [vmem:[%s898_s0] sm:$0xff]  ;;  %vm759_vm3 = vmpackc.low %vm42_vm0, %vm719_vm2  ;;  %s721_s1 = smov 126  }
   0x3   :  { %v691_v7 = vpack.i.bf16 %v16_v4, %v15_v2  ;;  %v643_v8 = vpack.c.bf16 %v16_v4, %v15_v2  ;;  %615 = vmatprep.mubr.msk.f32.mxu0 %vm35_vm1, %v11_v6  ;;  %v553_v10 = vld [vmem:[%s898_s0 + $0x10] sm:$0xff]  ;;  %v12_v12 = vld [vmem:[%s898_s0 + $0x8] sm:$0x3]  ;;  %v561_v14 = vld [vmem:[%s898_s0 + $0x20] sm:$0xff] }
   0x4   :  { %682 = vrot.lane.b32.xlu0 %v681_v3, %s720_s19  ;;  %640 = vmatprep.subr.bf16.mxu0 %v639_v5  ;;  %v566_v13 = vld [vmem:[%s898_s0 + $0x30] sm:$0xff]  ;;  %v567_v15 = vld [vmem:[%s898_s0 + $0x38] sm:$0x3]  ;;  %v562_v33 = vld [vmem:[%s898_s0 + $0x28] sm:$0x3] }
   0x5   :  { %692 = vrot.lane.b32.xlu1 %v691_v7, %s720_s19  ;;  %642 = vmatpush3.bf16.msra.mxu0 %v639_v5  ;;  %v554_v32 = vld [vmem:[%s898_s0 + $0x18] sm:$0x3] }
   0x6   :  { %645 = vmatprep.subr.msk.bf16.mxu0 %vm759_vm3, %v643_v8  ;;  %604 = vmatprep.mubr.msk.f32.mxu1 %vm35_vm1, %v553_v10 }
   0x8   :  { %687 = vrot.lane.b32.xlu0 %v681_v3, %s721_s1 }
   0x9   :  { %697 = vrot.lane.b32.xlu1 %v691_v7, %s721_s1  ;;  %648 = vmatpush3.bf16.msk.msra.mxu0 %vm759_vm3, %v643_v8 }
   0xc   :  { %616 = vmatmul.mubr.msk.f32.vlgmr.msra.gmra.mrb[0].mxu0 %vm35_vm1, %v12_v12  ;;  %307 = vperm.xlu0 %701, %v566_v13   ;;  %v723_v12 = vmov 683565275  }
   0xd   :  { %626 = vmatprep.mubr.msk.f32.mxu0 %vm35_vm1, %v561_v14  ;;  %312 = vperm.xlu1 %702, %v567_v15  }
  0x76   :  { %v683_v16 = vpop.permute.xlu0 %682 }
  0x77   :  { %v685_v17 = vunpack.i.h.bf16 %v683_v16  ;;  %v684_v18 = vunpack.i.l.bf16 %v683_v16  ;;  %v693_v19 = vpop.permute.xlu1 %692  ;;  %v724_v16 = vmov 2475754826  }
  0x78   :  { %v695_v20 = vunpack.i.h.bf16 %v693_v19  ;;  %v694_v21 = vunpack.i.l.bf16 %v693_v19 }
  0x79   :  { %v629_v22 = vpack.c.bf16 %v685_v17, %v684_v18  ;;  %v725_v18 = vmov 2131351028  }
  0x7a   :  { %v633_v23 = vpack.c.bf16 %v695_v20, %v694_v21  ;;  %v688_v24 = vpop.permute.xlu0 %687  ;;  %v726_v20 = vmov 2102212464  }
  0x7b   :  { %v690_v25 = vunpack.i.h.bf16 %v688_v24  ;;  %v689_v26 = vunpack.i.l.bf16 %v688_v24  ;;  %630 = vmatprep.subr.bf16.mxu1 %v629_v22  ;;  %v698_v27 = vpop.permute.xlu1 %697 }
  0x7c   :  { %632 = vmatpush3.bf16.msra.mxu1 %v629_v22  ;;  %v700_v28 = vunpack.i.h.bf16 %v698_v27  ;;  %v699_v29 = vunpack.i.l.bf16 %v698_v27  ;;  %v727_v22 = vmov 920167782  }
  0x7d   :  { %v649_v30 = vpack.c.bf16 %v690_v25, %v689_v26  ;;  %635 = vmatprep.subr.msk.bf16.mxu1 %vm759_vm3, %v633_v23 }
  0x7e   :  { %v653_v31 = vpack.c.bf16 %v700_v28, %v699_v29  ;;  %v728_v29 = vmov 1326507024  }
  0x7f   :  { %650 = vmatprep.subr.bf16.mxu0 %v649_v30 }
  0x80   :  { %638 = vmatpush3.bf16.msk.msra.mxu1 %vm759_vm3, %v633_v23  ;;  %652 = vmatpush3.bf16.msra.mxu0 %v649_v30 }
  0x81   :  { %655 = vmatprep.subr.msk.bf16.mxu0 %vm759_vm3, %v653_v31 }
  0x83   :  { %605 = vmatmul.mubr.msk.f32.vlgmr.msra.gmra.mrb[0].mxu1 %vm35_vm1, %v554_v32 }
  0x84   :  { %658 = vmatpush3.bf16.msk.msra.mxu0 %vm759_vm3, %v653_v31 }
  0x87   :  { %627 = vmatmul.mubr.msk.f32.vlgmr.msra.gmra.mrb[0].mxu0 %vm35_vm1, %v562_v33 }
  0x8b   :  { %v308_v40 = vpop.permute.xlu0 %307 }
  0x8c   :  { %v313_v37 = vpop.permute.xlu1 %312 }
 0x156   :  { %v606_v34 = vpop.f32.mrb[0].mxu1 }
 0x157   :  { %v111_v35 = vpop.f32.mrb[1].mxu1 }
 0x15a   :  { %v628_v36 = vpop.f32.mrb[0].mxu0 }
 0x15b   :  { %v659_v38 = vadd.f32 %v628_v36, %v606_v34  ;;  %v291_v39 = vpop.f32.mrb[1].mxu0 }
 0x15c   :  { %v660_v41 = vadd.f32 %v291_v39, %v111_v35 }
 0x15d   :  { %v316_v42 = vadd.f32 %v659_v38, %v313_v37 }
 0x15e   :  { %v315_v43 = vadd.f32 %v660_v41, %v308_v40 }
 0x15f   :  { %v318_v44 = vmax.f32 %v316_v42, 0.0 }
 0x160   :  { %v317_v45 = vmax.f32 %v315_v43, 0.0 }
 0x161   :  { %v320_v46 = vsub.f32 1.0, %v318_v44 }
 0x162   :  { %v319_v47 = vsub.f32 1.0, %v317_v45 }
 0x163   :  { %v569_v48 = vmul.f32 -1.442695, %v320_v46 }
 0x164   :  { %v568_v49 = vmul.f32 -1.442695, %v319_v47 }
 0x165   :  { %703 = vpow2.f32 %v569_v48 }
 0x166   :  { %705 = vpow2.f32 %v568_v49 }
 0x16f   :  { %v704_v50 = vpop.eup %703 }
 0x170   :  { %v706_v51 = vpop.eup %705  ;;  %v328_v52 = vadd.f32 1.0, %v704_v50 }
 0x171   :  { %v327_v53 = vadd.f32 1.0, %v706_v51 }
 0x172   :  { %707 = vrcp.f32 %v328_v52 }
 0x173   :  { %709 = vrcp.f32 %v327_v53 }
 0x17c   :  { %v802_v54 = vpop.eup %707 }
 0x17d   :  { %v804_v55 = vpop.eup %709  ;;  %v437_v56 = vand.u32 2147483647, %v802_v54  ;;  %v440_v57 = vand.u32 2139095040, %v802_v54  ;;  %vm439_vm15 = vcmp.lt.s32.totalorder %v802_v54, 0 }
 0x17e   :  { %v336_v58 = vand.u32 2139095040, %v804_v55  ;;  %v333_v61 = vand.u32 2147483647, %v804_v55 }
 0x17f   :  { %v441_v59 = vshrl.u32 %v440_v57, 23  ;;  %v444_v60 = vand.u32 8388607, %v437_v56  ;;  %vm856_vm1 = vcmp.le.f32.partialorder %v437_v56, 0.7853982 }
 0x180   :  { %v337_v62 = vshrl.u32 %v336_v58, 23  ;;  %v814_v3 = vand.u32 8388607, %v333_v61 }
 0x181   :  { %v574_v63 = vadd.s32 4294967169, %v441_v59  ;;  %v445_v2 = vor.u32 8388608, %v444_v60 }
 0x182   :  { %v570_v0 = vadd.s32 4294967169, %v337_v62  ;;  %v341_v10 = vor.u32 8388608, %v814_v3 }
 0x183   :  { %v447_v1 = vadd.s32 1, %v574_v63  ;;  %v816_v9 = vshll.u32 %v445_v2, 8 }
 0x184   :  { %v343_v4 = vadd.s32 1, %v570_v0 }
 0x185   :  { %vm448_vm4 = vcmp.gt.s32.totalorder %v447_v1, 0 }
 0x186   :  { %v449_v5 = vsel %vm448_vm4, %v447_v1, 0  ;;  %vm344_vm5 = vcmp.gt.s32.totalorder %v343_v4, 0  ;;  %vm335_vm4 = vcmp.lt.s32.totalorder %v804_v55, 0 }
 0x187   :  { %v450_v6 = vshrl.u32 %v449_v5, 5  ;;  %v451_v7 = vand.u32 31, %v449_v5  ;;  %v345_v8 = vsel %vm344_vm5, %v343_v4, 0  ;;  %v381_v4 = vshll.u32 %v341_v10, 8 }
 0x188   :  { %v819_v14 = vshrl.u32 %v345_v8, 5  ;;  %v347_v15 = vand.u32 31, %v345_v8  ;;  %vm334_vm5 = vcmp.le.f32.partialorder %v333_v61, 0.7853982 }
 0x189   :  { %v452_v11 = vsub.s32 32, %v451_v7  ;;  %v454_v13 = vshll.u32 %v723_v12, %v451_v7  ;;  %v457_v17 = vshll.u32 %v724_v16, %v451_v7  ;;  %v460_v19 = vshll.u32 %v725_v18, %v451_v7 }
 0x18a   :  { %v463_v21 = vshll.u32 %v726_v20, %v451_v7  ;;  %v466_v23 = vshll.u32 %v727_v22, %v451_v7  ;;  %vm469_vm6 = vcmp.lt.s32.totalorder %v450_v6, 1  ;;  %vm470_vm7 = vcmp.lt.s32.totalorder %v450_v6, 2 }
 0x18b   :  { %v455_v24 = vshrl.u32 %v724_v16, %v452_v11  ;;  %v458_v25 = vshrl.u32 %v725_v18, %v452_v11  ;;  %v461_v26 = vshrl.u32 %v726_v20, %v452_v11  ;;  %v453_v27 = vshrl.u32 %v723_v12, %v452_v11 }
 0x18c   :  { %v464_v28 = vshrl.u32 %v727_v22, %v452_v11  ;;  %v467_v30 = vshrl.u32 %v728_v29, %v452_v11  ;;  %v348_v34 = vsub.s32 32, %v347_v15  ;;  %vm471_vm8 = vcmp.lt.s32.totalorder %v450_v6, 3 }
 0x18d   :  { %v456_v31 = vor.u32 %v455_v24, %v454_v13  ;;  %v459_v32 = vor.u32 %v458_v25, %v457_v17  ;;  %v462_v33 = vor.u32 %v461_v26, %v460_v19  ;;  %vm472_vm9 = vcmp.lt.s32.totalorder %v450_v6, 4 }
 0x18e   :  { %v465_v35 = vor.u32 %v464_v28, %v463_v21  ;;  %v468_v36 = vor.u32 %v467_v30, %v466_v23  ;;  %v350_v44 = vshll.u32 %v723_v12, %v347_v15  ;;  %v351_v47 = vshrl.u32 %v724_v16, %v348_v34 }
 0x18f   :  { %v473_v37 = vsel %vm469_vm6, %v453_v27, %v456_v31  ;;  %v474_v38 = vsel %vm472_vm9, %v462_v33, 2102212464  ;;  %v477_v39 = vsel %vm469_vm6, %v456_v31, %v459_v32  ;;  %v481_v40 = vsel %vm469_vm6, %v459_v32, %v462_v33 }
 0x190   :  { %v475_v41 = vsel %vm471_vm8, %v459_v32, %v474_v38  ;;  %v478_v42 = vsel %vm472_vm9, %v465_v35, 920167782  ;;  %v482_v43 = vsel %vm472_vm9, %v468_v36, 1326507024  ;;  %v353_v48 = vshll.u32 %v724_v16, %v347_v15 }
 0x191   :  { %v479_v45 = vsel %vm471_vm8, %v462_v33, %v478_v42  ;;  %v483_v46 = vsel %vm471_vm8, %v465_v35, %v482_v43  ;;  %v476_v49 = vsel %vm470_vm7, %v473_v37, %v475_v41  ;;  %v354_v52 = vshrl.u32 %v725_v18, %v348_v34 }
 0x192   :  { %v480_v50 = vsel %vm470_vm7, %v477_v39, %v479_v45  ;;  %v484_v51 = vsel %vm470_vm7, %v481_v40, %v483_v46  ;;  %v352_v60 = vor.u32 %v351_v47, %v350_v44  ;;  %v356_v63 = vshll.u32 %v725_v18, %v347_v15 }
 0x193   :  { %v828_v53 = vmul.u32.u64.low %v816_v9, %v484_v51  ;;  %v829_v57 = vmul.u32.u64.high %v816_v9, %v484_v51, %v828_v53  ;;  %v832_v58 = vmul.u32.u64.low %v816_v9, %v480_v50  ;;  %v833_v59 = vmul.u32.u64.high %v816_v9, %v480_v50, %v832_v58 }
 0x194   :  { %v355_v62 = vor.u32 %v354_v52, %v353_v48  ;;  %v357_v0 = vshrl.u32 %v726_v20, %v348_v34  ;;  %v359_v1 = vshll.u32 %v726_v20, %v347_v15  ;;  %v360_v2 = vshrl.u32 %v727_v22, %v348_v34 }
 0x195   :  { %v363_v3 = vshrl.u32 %v728_v29, %v348_v34  ;;  %v492_v5 = vmul.u32 %v816_v9, %v476_v49  ;;  %v349_v6 = vshrl.u32 %v723_v12, %v348_v34  ;;  %v362_v8 = vshll.u32 %v727_v22, %v347_v15 }
 0x196   :  { %v358_v7 = vor.u32 %v357_v0, %v356_v63  ;;  %vm494_vm10 = vc.u32 %v829_v57, %v832_v58  ;;  %v495_v11 = vadd.s32 1, %v833_v59  ;;  %v361_v13 = vor.u32 %v360_v2, %v359_v1 }
 0x197   :  { %vm365_vm11 = vcmp.lt.s32.totalorder %v819_v14, 1  ;;  %v364_v16 = vor.u32 %v363_v3, %v362_v8  ;;  %vm367_vm12 = vcmp.lt.s32.totalorder %v819_v14, 3  ;;  %vm368_vm13 = vcmp.lt.s32.totalorder %v819_v14, 4 }
 0x198   :  { %v373_v17 = vsel %vm365_vm11, %v352_v60, %v355_v62  ;;  %v496_v10 = vsel %vm494_vm10, %v495_v11, %v833_v59  ;;  %v370_v9 = vsel %vm368_vm13, %v358_v7, 2102212464  ;;  %v374_v12 = vsel %vm368_vm13, %v361_v13, 920167782 }
 0x199   :  { %v377_v18 = vsel %vm365_vm11, %v355_v62, %v358_v7  ;;  %v497_v15 = vadd.s32 %v496_v10, %v492_v5  ;;  %vm366_vm14 = vcmp.lt.s32.totalorder %v819_v14, 2  ;;  %v375_v19 = vsel %vm367_vm12, %v358_v7, %v374_v12 }
 0x19a   :  { %v378_v20 = vsel %vm368_vm13, %v364_v16, 1326507024  ;;  %v369_v21 = vsel %vm365_vm11, %v349_v6, %v352_v60  ;;  %v371_v22 = vsel %vm367_vm12, %v355_v62, %v370_v9  ;;  %v376_v23 = vsel %vm366_vm14, %v373_v17, %v375_v19 }
 0x19b   :  { %v379_v24 = vsel %vm367_vm12, %v361_v13, %v378_v20  ;;  %v498_v25 = vadd.s32 536870912, %v497_v15  ;;  %v845_v27 = vmul.u32.u64.low %v381_v4, %v376_v23  ;;  %v846_v28 = vmul.u32.u64.high %v381_v4, %v376_v23, %v845_v27 }
 0x19c   :  { %v380_v26 = vsel %vm366_vm14, %v377_v18, %v379_v24  ;;  %v372_v32 = vsel %vm366_vm14, %v369_v21, %v371_v22  ;;  %v493_v51 = vadd.s32 %v832_v58, %v829_v57  ;;  %vm543_vm8 = vcmask 66560  }
 0x19d   :  { %v848_v29 = vmul.u32.u64.low %v381_v4, %v380_v26  ;;  %v849_v30 = vmul.u32.u64.high %v381_v4, %v380_v26, %v848_v29  ;;  %v499_v31 = vshrl.u32 %v498_v25, 30  ;;  %v391_v14 = vadd.s32 1, %v846_v28 }
 0x19e   :  { %v388_v35 = vmul.u32 %v381_v4, %v372_v32  ;;  %vm529_vm10 = vweird.f32 %v802_v54  ;;  %vm541_vm13 = vcmask 72704  }
 0x19f   :  { %v500_v33 = vshll.u32 %v499_v31, 30  ;;  %v523_v34 = vsub.s32 4, %v499_v31  ;;  %vm390_vm0 = vc.u32 %v849_v30, %v845_v27  ;;  %v389_v8 = vadd.s32 %v845_v27, %v849_v30 }
 0x1a0   :  { %v392_v39 = vsel %vm390_vm0, %v391_v14, %v846_v28 }
 0x1a1   :  { %v501_v37 = vsub.s32 %v497_v15, %v500_v33  ;;  %v524_v38 = vsel %vm439_vm15, %v523_v34, %v499_v31  ;;  %v393_v41 = vadd.s32 %v392_v39, %v388_v35 }
 0x1a2   :  { %v526_v40 = vsel %vm856_vm1, 0, %v524_v38 }
 0x1a3   :  { %v503_v42 = vsub.s32 0, %v501_v37  ;;  %v394_v43 = vadd.s32 536870912, %v393_v41  ;;  %v530_v24 = vadd.s32 3, %v526_v40 }
 0x1a5   :  { %v575_v44 = vmin.u32 %v503_v42, %v501_v37  ;;  %v395_v45 = vshrl.u32 %v394_v43, 30  ;;  %v531_v28 = vand.u32 3, %v530_v24 }
 0x1a7   :  { %v505_v46 = vclz %v575_v44  ;;  %v396_v47 = vshll.u32 %v395_v45, 30  ;;  %v419_v23 = vsub.s32 4, %v395_v45  ;;  %vm536_vm6 = vcmp.eq.s32.totalorder %v531_v28, 2 }
 0x1a8   :  { %vm533_vm7 = vcmp.eq.s32.totalorder %v531_v28, 0  ;;  %vm532_vm9 = vcmp.lt.s32.totalorder %v531_v28, 2 }
 0x1a9   :  { %v576_v56 = vadd.s32 4294967294, %v505_v46  ;;  %v397_v48 = vsub.s32 %v393_v41, %v396_v47  ;;  %v420_v27 = vsel %vm335_vm4, %v419_v23, %v395_v45 }
 0x1aa   :  { %v422_v31 = vsel %vm334_vm5, 0, %v420_v27 }
 0x1ab   :  { %vm577_vm2 = vcmp.lt.s32.totalorder %v576_v56, 0  ;;  %v399_v50 = vsub.s32 0, %v397_v48  ;;  %v426_v35 = vadd.s32 3, %v422_v31 }
 0x1ac   :  { %v508_v49 = vsel %vm577_vm2, 0, %v576_v56 }
 0x1ad   :  { %v509_v52 = vsub.s32 32, %v508_v49  ;;  %v513_v53 = vsub.s32 4294967266, %v508_v49  ;;  %v571_v59 = vmin.u32 %v399_v50, %v397_v48  ;;  %v510_v60 = vshll.u32 %v501_v37, %v508_v49 }
 0x1ae   :  { %v427_v38 = vand.u32 3, %v426_v35 }
 0x1af   :  { %v511_v62 = vshrl.u32 %v493_v51, %v509_v52  ;;  %v514_v63 = vadd.s32 127, %v513_v53  ;;  %v401_v0 = vclz %v571_v59 }
 0x1b0   :  { %vm432_vm11 = vcmp.eq.s32.totalorder %v427_v38, 2  ;;  %vm429_vm12 = vcmp.eq.s32.totalorder %v427_v38, 0  ;;  %vm428_vm14 = vcmp.lt.s32.totalorder %v427_v38, 2 }
 0x1b1   :  { %v512_v1 = vor.u32 %v511_v62, %v510_v60  ;;  %v515_v2 = vshll.u32 %v514_v63, 23  ;;  %v572_v3 = vadd.s32 4294967294, %v401_v0 }
 0x1b3   :  { %v516_v4 = vor.u32 4788187, %v515_v2  ;;  %vm573_vm3 = vcmp.lt.s32.totalorder %v572_v3, 0  ;;  %v519_v6 = vcvt.s32.f32 %v512_v1 }
 0x1b4   :  { %v404_v7 = vsel %vm573_vm3, 0, %v572_v3 }
 0x1b5   :  { %v517_v5 = vand.u32 2147483647, %v516_v4  ;;  %v405_v11 = vsub.s32 32, %v404_v7  ;;  %v409_v13 = vsub.s32 4294967266, %v404_v7  ;;  %v406_v58 = vshll.u32 %v397_v48, %v404_v7 }
 0x1b7   :  { %v520_v57 = vmul.f32 %v519_v6, %v517_v5  ;;  %v407_v16 = vshrl.u32 %v389_v8, %v405_v11  ;;  %v410_v17 = vadd.s32 127, %v409_v13 }
 0x1b9   :  { %v521_v10 = vxor.u32 2147483648, %v520_v57  ;;  %v408_v9 = vor.u32 %v407_v16, %v406_v58  ;;  %v411_v12 = vshll.u32 %v410_v17, 23 }
 0x1bb   :  { %v522_v18 = vsel %vm439_vm15, %v521_v10, %v520_v57  ;;  %v412_v19 = vor.u32 4788187, %v411_v12  ;;  %v415_v21 = vcvt.s32.f32 %v408_v9  ;;  %vm425_vm15 = vweird.f32 %v804_v55 }
 0x1bc   :  { %v525_v15 = vsel %vm856_vm1, %v802_v54, %v522_v18 }
 0x1bd   :  { %711 = vcosq.f32 %v525_v15  ;;  %v413_v20 = vand.u32 2147483647, %v412_v19 }
 0x1be   :  { %713 = vsinq.f32 %v525_v15 }
 0x1bf   :  { %v416_v22 = vmul.f32 %v415_v21, %v413_v20 }
 0x1c1   :  { %v417_v25 = vxor.u32 2147483648, %v416_v22 }
 0x1c3   :  { %v418_v26 = vsel %vm335_vm4, %v417_v25, %v416_v22 }
 0x1c4   :  { %v421_v29 = vsel %vm334_vm5, %v804_v55, %v418_v26 }
 0x1c5   :  { %715 = vcosq.f32 %v421_v29 }
 0x1c6   :  { %717 = vsinq.f32 %v421_v29 }
 0x1c7   :  { %v712_v30 = vpop.eup %711 }
 0x1c8   :  { %v714_v32 = vpop.eup %713  ;;  %v537_v33 = vxor.u32 2147483648, %v712_v30 }
 0x1c9   :  { %v534_v34 = vxor.u32 2147483648, %v714_v32 }
 0x1ca   :  { %v538_v14 = vsel %vm536_vm6, %v537_v33, %v714_v32 }
 0x1cb   :  { %v535_v36 = vsel %vm533_vm7, %v712_v30, %v534_v34 }
 0x1cc   :  { %v539_v61 = vsel %vm532_vm9, %v535_v36, %v538_v14 }
 0x1cd   :  { %v540_v37 = vsel %vm529_vm10, nan, %v539_v61 }
 0x1ce   :  { %544 = vst.msk [vmem:[%s899_s2 + $0x8] sm:$0x3] %vm543_vm8, %v540_v37  ;;  %546 = vst.msk [vmem:[%s899_s2 + $0x12] sm:$0x3] %vm543_vm8, %v540_v37 }
 0x1cf   :  { %548 = vst.msk [vmem:[%s899_s2 + $0x1c] sm:$0x3] %vm543_vm8, %v540_v37  ;;  %v716_v39 = vpop.eup %715 }
 0x1d0   :  { %v718_v40 = vpop.eup %717  ;;  %v433_v41 = vxor.u32 2147483648, %v716_v39 }
 0x1d1   :  { %v430_v42 = vxor.u32 2147483648, %v718_v40 }
 0x1d2   :  { %v434_v54 = vsel %vm432_vm11, %v433_v41, %v718_v40 }
 0x1d3   :  { %v431_v43 = vsel %vm429_vm12, %v716_v39, %v430_v42 }
 0x1d4   :  { %v435_v44 = vsel %vm428_vm14, %v431_v43, %v434_v54 }
 0x1d5   :  { %v436_v45 = vsel %vm425_vm15, nan, %v435_v44 }
 0x1d6   :  { %542 = vst.msk [vmem:[%s899_s2] sm:$0xff] %vm541_vm13, %v436_v45  ;;  %545 = vst.msk [vmem:[%s899_s2 + $0xa] sm:$0xff] %vm541_vm13, %v436_v45 }
 0x1d7   :  { %547 = vst.msk [vmem:[%s899_s2 + $0x14] sm:$0xff] %vm541_vm13, %v436_v45 }

</bundles_post_ra>
